<compile_context>
chip_gen: v6e
topology: v6e:2x2x1
jax: 0.10.0
libtpu: 0.0.40
codegen_flags: <defaults>
</compile_context>

<pallas_src>
import jax
import jax.numpy as jnp
from jax.experimental import pallas as pl
from jax.experimental.pallas import tpu as pltpu


# ----------------------------- small helpers --------------------------------

def _round_up(x, m):
    return (x + m - 1) // m * m


def _cdiv(a, b):
    return -(-a // b)


def _sublane_align(dtype):
    itemsize = jnp.dtype(dtype).itemsize
    return {4: 8, 2: 16, 1: 32}.get(itemsize, 8)


def _pick_tile(dim, target, align):
    """Aligned tile <= target chosen to minimize zero padding of `dim`."""
    target = max(align, (target // align) * align)
    if dim <= target:
        return _round_up(dim, align)
    ntiles = _cdiv(dim, target)
    return _round_up(_cdiv(dim, ntiles), align)


def _generation():
    try:
        kind = jax.devices()[0].device_kind.lower()
    except Exception:
        kind = ""
    if "v5" in kind:
        return "v5e"
    if "v6" in kind or "trillium" in kind:
        return "v6e"
    if "v7" in kind:
        return "v7x"
    return "unknown"


# Per generation: (tm_target, tn_target, tk_target, vmem_limit_bytes, vmem_budget)
_GEN_CFG = {
    "v5e":     (512,  512,  512, None,     14 << 20),   # fits 16 MiB default scoped VMEM
    "v6e":     (2048, 1024, 512, 64 << 20, 52 << 20),   # AI ~680 FLOP/byte
    "v7x":     (1024, 2048, 512, 48 << 20, 40 << 20),   # budget vs 64 MiB/TC, not 128
    "unknown": (512,  512,  512, None,     14 << 20),
}


def _vmem_bytes(tm, tn, tk, compute_itemsize, out_itemsize, use_scratch):
    # double-buffered X / W / bias / out tiles + optional f32 accumulator scratch
    b = 2 * (tm * tk + tk * tn) * compute_itemsize
    b += 2 * tn * 4                       # bias tile (1, tn) f32
    b += 2 * tm * tn * out_itemsize
    if use_scratch:
        b += tm * tn * 4
    return b


# ------------------------------- kernels -------------------------------------

def _linear_kernel_acc(x_ref, w_ref, b_ref, o_ref, acc_ref):
    """Narrow-output variant: f32 accumulator scratch, cast + bias in epilogue."""
    k = pl.program_id(2)
    partial = jnp.dot(x_ref[...], w_ref[...], preferred_element_type=jnp.float32)

    @pl.when(k == 0)
    def _init():
        acc_ref[...] = partial            # no zero-init store pass

    @pl.when(k > 0)
    def _accum():
        acc_ref[...] += partial

    @pl.when(k == pl.num_programs(2) - 1)
    def _finalize():
        o_ref[...] = (acc_ref[...] + b_ref[...]).astype(o_ref.dtype)


def _linear_kernel_f32_out(x_ref, w_ref, b_ref, o_ref):
    """f32-output variant: accumulate directly into the resident output block."""
    k = pl.program_id(2)
    partial = jnp.dot(x_ref[...], w_ref[...], preferred_element_type=jnp.float32)

    @pl.when(k == 0)
    def _init():
        o_ref[...] = partial

    @pl.when(k > 0)
    def _accum():
        o_ref[...] += partial

    @pl.when(k == pl.num_programs(2) - 1)
    def _finalize():
        o_ref[...] += b_ref[...]


# ------------------------------- wrapper --------------------------------------

class PreparedLinear:
    """Pads + casts (weight, bias) ONCE so the per-call hot path only touches X."""

    def __init__(self, weight, bias, *, compute_dtype=jnp.bfloat16, tn=None, tk=None):
        K, N = weight.shape
        bias = jnp.reshape(bias, (1, N))          # accept (N,) or (1, N)

        gen = _generation()
        tm_t, tn_t, tk_t, vmem_limit, vmem_budget = _GEN_CFG[gen]
        self.gen = gen
        self.vmem_limit = vmem_limit
        self.vmem_budget = vmem_budget
        self.tm_target = tm_t

        # NOTE: bf16 operands (MXU fast path, half the DMA bytes) with f32
        # accumulation; pass compute_dtype=jnp.float32 for bit-faithful f32 math.
        self.compute_dtype = jnp.dtype(compute_dtype)

        self.tn = tn if tn is not None else _pick_tile(N, tn_t, 128)
        self.tk = tk if tk is not None else _pick_tile(K, tk_t, 128)
        self.K, self.N = K, N
        self.Kp, self.Np = _round_up(K, self.tk), _round_up(N, self.tn)

        wp = weight
        if (self.Kp, self.Np) != (K, N):
            wp = jnp.pad(wp, ((0, self.Kp - K), (0, self.Np - N)))
        self.wp = wp.astype(self.compute_dtype)

        bp = bias.astype(jnp.float32)
        if self.Np != N:
            bp = jnp.pad(bp, ((0, 0), (0, self.Np - N)))
        self.bp = bp


def my_linear(x, prepared, *, tm=None, out_dtype=None):
    """out = x @ weight + bias  (torch MyLinear.forward semantics)."""
    M, K = x.shape
    assert K == prepared.K
    pr = prepared
    out_dtype = jnp.dtype(x.dtype if out_dtype is None else out_dtype)
    compute_dtype = pr.compute_dtype
    sub = _sublane_align(compute_dtype)

    tn, tk, Np, Kp = pr.tn, pr.tk, pr.Np, pr.Kp

    if tm is None:
        tm = _pick_tile(M, pr.tm_target, sub)
    else:
        tm = _round_up(min(tm, _round_up(M, sub)), sub)

    # v7x: make sure both TensorCores get at least one output tile.
    if pr.gen == "v7x" and _cdiv(M, tm) * _cdiv(pr.N, tn) < 2 and M > sub:
        tm = _pick_tile(M, _round_up(_cdiv(M, 2), sub), sub)

    use_scratch = out_dtype != jnp.dtype(jnp.float32)

    # Safety clamp: shrink tm until the double-buffered working set fits VMEM.
    while (_vmem_bytes(tm, tn, tk, compute_dtype.itemsize, out_dtype.itemsize,
                       use_scratch) > pr.vmem_budget and tm > sub):
        new_tm = max(sub, _round_up(tm // 2, sub))
        if new_tm == tm:
            break
        tm = new_tm

    Mp = _round_up(M, tm)
    xp = x
    if (Mp, Kp) != (M, K):
        xp = jnp.pad(xp, ((0, Mp - M), (0, Kp - K)))   # zero-padded K is a no-op
    xp = xp.astype(compute_dtype)

    grid = (Mp // tm, Np // tn, Kp // tk)

    # HBM traffic including block re-reads of X (per N tile) and W (per M tile).
    bytes_accessed = (
        (Np // tn) * Mp * Kp * compute_dtype.itemsize
        + (Mp // tm) * Kp * Np * compute_dtype.itemsize
        + Np * 4
        + Mp * Np * out_dtype.itemsize
    )
    cost = pl.CostEstimate(flops=2 * Mp * Kp * Np, transcendentals=0,
                           bytes_accessed=bytes_accessed)

    cp_kwargs = dict(dimension_semantics=("parallel", "parallel", "arbitrary"))
    if pr.vmem_limit is not None:
        cp_kwargs["vmem_limit_bytes"] = pr.vmem_limit

    kernel = _linear_kernel_acc if use_scratch else _linear_kernel_f32_out
    scratch = ([pltpu.VMEM((tm, tn), jnp.float32)] if use_scratch else [])

    out_padded = pl.pallas_call(
        kernel,
        out_shape=jax.ShapeDtypeStruct((Mp, Np), out_dtype),
        grid_spec=pltpu.PrefetchScalarGridSpec(
            num_scalar_prefetch=0,
            grid=grid,
            in_specs=[
                pl.BlockSpec((tm, tk), lambda i, j, k: (i, k)),   # X tile
                pl.BlockSpec((tk, tn), lambda i, j, k: (k, j)),   # W tile
                pl.BlockSpec((1, tn), lambda i, j, k: (0, j)),    # bias tile
            ],
            out_specs=pl.BlockSpec((tm, tn), lambda i, j, k: (i, j)),
            scratch_shapes=scratch,
        ),
        compiler_params=pltpu.CompilerParams(**cp_kwargs),
        cost_estimate=cost,
    )(xp, pr.wp, pr.bp)

    if (Mp, Np) != (M, pr.N):
        out_padded = out_padded[:M, :pr.N]
    return out_padded


if __name__ == "__main__":
    # Small shapes consistent with MyLinear(input=32, output=16), batch=8.
    # At this tiny size overhead dominates; the tiling logic targets large M, K, N.
    batch, in_features, out_features = 8, 32, 16

    key = jax.random.PRNGKey(0)
    kx, kw = jax.random.split(key)

    # Deterministic parameter init (torch.randn -> standard normal; bias zeros).
    weight = jax.random.normal(kw, (in_features, out_features), dtype=jnp.float32)
    bias = jnp.zeros((1, out_features), dtype=jnp.float32)
    x = jax.random.normal(kx, (batch, in_features), dtype=jnp.float32)

    # Pad + cast the weight/bias once (hoisted out of the per-call hot path).
    prep = PreparedLinear(weight, bias)

    # f32 output path: accumulates directly into the output block (no scratch).
    out = my_linear(x, prep)
    jax.block_until_ready(out)
    assert out.shape == (batch, out_features)

    # Tight check vs a reference with matching bf16-operand / f32-accum precision.
    ref_bf16 = jnp.matmul(
        x.astype(jnp.bfloat16), weight.astype(jnp.bfloat16),
        preferred_element_type=jnp.float32,
    ) + bias
    assert jnp.allclose(out, ref_bf16, atol=1e-3, rtol=1e-3)

    # Loose sanity check vs the exact f32 torch-style reference.
    ref_f32 = jnp.matmul(x, weight) + bias
    assert jnp.allclose(out, ref_f32, atol=3e-1, rtol=3e-2)

    # bf16 output path: exercises the f32-accumulator-scratch kernel variant.
    out_bf16 = my_linear(x, prep, out_dtype=jnp.bfloat16)
    jax.block_until_ready(out_bf16)
    assert out_bf16.dtype == jnp.bfloat16
    assert jnp.allclose(out_bf16.astype(jnp.float32), ref_bf16, atol=1e-1, rtol=2e-2)

    print("KERNEL_OK")
</pallas_src>

<mosaic_0001>
module attributes {stable_mosaic.version = 11 : i64} {
  func.func @_linear_kernel_f32_out(%arg0: i32, %arg1: i32, %arg2: i32, %arg3: memref<16x128xbf16, #tpu.memory_space<vmem>>, %arg4: memref<128x128xbf16, #tpu.memory_space<vmem>>, %arg5: memref<1x128xf32, #tpu.memory_space<vmem>>, %arg6: memref<16x128xf32, #tpu.memory_space<vmem>>) attributes {dimension_semantics = [#tpu.dimension_semantics<parallel>, #tpu.dimension_semantics<parallel>, #tpu.dimension_semantics<arbitrary>], iteration_bounds = array<i64: 1, 1, 1>, scalar_prefetch = 0 : i64, scratch_operands = 0 : i64, tpu.core_type = #tpu.core_type<tc>, window_params = [{transform_indices = @transform_0, window_bounds = array<i64: 16, 128>}, {transform_indices = @transform_1, window_bounds = array<i64: 128, 128>}, {transform_indices = @transform_2, window_bounds = array<i64: 1, 128>}, {transform_indices = @transform_3, window_bounds = array<i64: 16, 128>}]} {
    %c0 = arith.constant 0 : index
    %c0_0 = arith.constant 0 : index
    %0 = vector.load %arg3[%c0, %c0_0] : memref<16x128xbf16, #tpu.memory_space<vmem>>, vector<16x128xbf16>
    %c0_1 = arith.constant 0 : index
    %c0_2 = arith.constant 0 : index
    %1 = vector.load %arg4[%c0_1, %c0_2] : memref<128x128xbf16, #tpu.memory_space<vmem>>, vector<128x128xbf16>
    %cst = arith.constant dense<0.000000e+00> : vector<16x128xf32>
    %2 = tpu.matmul %0, %1, %cst {dimension_numbers = #tpu.dot_dimension_numbers<[1], [0], [0], [1], [0, 0, 1, 1], [], []>} : vector<16x128xbf16>, vector<128x128xbf16>, vector<16x128xf32> -> vector<16x128xf32>
    %c0_i32 = arith.constant 0 : i32
    %3 = arith.cmpi eq, %arg2, %c0_i32 : i32
    %4 = arith.extui %3 : i1 to i32
    %c0_i32_3 = arith.constant 0 : i32
    %5 = arith.cmpi ne, %4, %c0_i32_3 : i32
    scf.if %5 {
      %c0_8 = arith.constant 0 : index
      %c0_9 = arith.constant 0 : index
      %12 = vector.load %arg6[%c0_8, %c0_9] : memref<16x128xf32, #tpu.memory_space<vmem>>, vector<16x128xf32>
      tpu.vector_store %arg6[%c0_8, %c0_9], %2 {strides = array<i32>} : memref<16x128xf32, #tpu.memory_space<vmem>>, vector<16x128xf32>,
    } else {
    }
    %c0_i32_4 = arith.constant 0 : i32
    %6 = arith.cmpi sgt, %arg2, %c0_i32_4 : i32
    %7 = arith.extui %6 : i1 to i32
    %c0_i32_5 = arith.constant 0 : i32
    %8 = arith.cmpi ne, %7, %c0_i32_5 : i32
    scf.if %8 {
      %c0_8 = arith.constant 0 : index
      %c0_9 = arith.constant 0 : index
      %12 = vector.load %arg6[%c0_8, %c0_9] : memref<16x128xf32, #tpu.memory_space<vmem>>, vector<16x128xf32>
      %13 = arith.addf %12, %2 : vector<16x128xf32>
      %c0_10 = arith.constant 0 : index
      %c0_11 = arith.constant 0 : index
      %14 = vector.load %arg6[%c0_10, %c0_11] : memref<16x128xf32, #tpu.memory_space<vmem>>, vector<16x128xf32>
      tpu.vector_store %arg6[%c0_10, %c0_11], %13 {strides = array<i32>} : memref<16x128xf32, #tpu.memory_space<vmem>>, vector<16x128xf32>,
    } else {
    }
    %c0_i32_6 = arith.constant 0 : i32
    %9 = arith.cmpi eq, %arg2, %c0_i32_6 : i32
    %10 = arith.extui %9 : i1 to i32
    %c0_i32_7 = arith.constant 0 : i32
    %11 = arith.cmpi ne, %10, %c0_i32_7 : i32
    scf.if %11 {
      %c0_8 = arith.constant 0 : index
      %c0_9 = arith.constant 0 : index
      %12 = vector.load %arg6[%c0_8, %c0_9] : memref<16x128xf32, #tpu.memory_space<vmem>>, vector<16x128xf32>
      %c0_10 = arith.constant 0 : index
      %c0_11 = arith.constant 0 : index
      %13 = vector.load %arg5[%c0_10, %c0_11] : memref<1x128xf32, #tpu.memory_space<vmem>>, vector<1x128xf32>
      %14 = vector.broadcast %13 : vector<1x128xf32> to vector<16x128xf32>
      %15 = arith.addf %12, %14 : vector<16x128xf32>
      %c0_12 = arith.constant 0 : index
      %c0_13 = arith.constant 0 : index
      %16 = vector.load %arg6[%c0_12, %c0_13] : memref<16x128xf32, #tpu.memory_space<vmem>>, vector<16x128xf32>
      tpu.vector_store %arg6[%c0_12, %c0_13], %15 {strides = array<i32>} : memref<16x128xf32, #tpu.memory_space<vmem>>, vector<16x128xf32>,
    } else {
    }
    return
  }
  func.func @transform_0(%arg0: i32, %arg1: i32, %arg2: i32) -> (i32, i32) {
    %c0_i32 = arith.constant 0 : i32
    return %arg0, %arg2 : i32, i32
  }
  func.func @transform_1(%arg0: i32, %arg1: i32, %arg2: i32) -> (i32, i32) {
    %c0_i32 = arith.constant 0 : i32
    return %arg2, %arg1 : i32, i32
  }
  func.func @transform_2(%arg0: i32, %arg1: i32, %arg2: i32) -> (i32, i32) {
    %c0_i32 = arith.constant 0 : i32
    %c0_i32_0 = arith.constant 0 : i32
    return %c0_i32, %arg1 : i32, i32
  }
  func.func @transform_3(%arg0: i32, %arg1: i32, %arg2: i32) -> (i32, i32) {
    %c0_i32 = arith.constant 0 : i32
    return %arg0, %arg1 : i32, i32
  }
}

</mosaic_0001>

<bundles_post_ra>
// kernel: tpu_custom_call.1
= control target key start
LH: loop header
LB: loop body
LE: loop exit
PB: predicated region body
PF: predicated region fallthrough
CT: control target
= control target key end

     0   :  { %8 = vsyncpa [#allocation3], 0  ;;  %s371_s0 = inlined_call_operand.hbm [shape: bf16[16,128], index: 0, kind: input, shape index: {}]   ;;  %s372_s1 = inlined_call_operand.hbm [shape: bf16[128,128], index: 1, kind: input, shape index: {}]   ;;  %s373_s2 = inlined_call_operand.vmem [shape: f32[1,128], index: 2, kind: input, shape index: {}]   ;;  %s374_s3 = inlined_call_operand.hbm [shape: f32[16,128], index: 3, kind: output, shape index: {}]  }
   0x1   :  { %9 = vsyncpa [#allocation6], 0 }
   0x2   :  { %10 = vsyncpa [#allocation4], 0  ;;  %s330_s12 = smov [#allocation2]  }
   0x3   :  { %s16_s13 = sshll.u32 %s330_s12, 4  ;;  %s17_s13 = int_to_ptr.vmem [resolvable:$true] %s16_s13 }
   0x4   :  { %s272_s14 = scalar_lea.vmem %s17_s13, 128  ;;  %p277_p1 = scmp.lt.s32.totalorder %s17_s13, %s17_s13 }
   0x5   :  { %p273_p0 = scmp.ne.s32.totalorder %s17_s13, %s272_s14  ;;  %p278_p2 = scmp.lt.s32.totalorder %s272_s14, %s272_s14 }
   0x7   :  { %p279_p3 = por %p278_p2, %p277_p1 }
   0x9   :  { %p280_p4 = pnand %p279_p3, %p273_p0 }
   0xb   :  { %283 = shalt.err (!%p280_p4)
}
   0xc   :  { %s331_s15 = smov 64   ;;  %s332_s16 = smov 4  }
   0xd   :  { %22 = dma.hbm_to_vmem [thread:$0]  %s371_s0, 128, %s17_s13, [#allocation3], %s331_s15, %s331_s15, %s332_s16  }
   0xe   :  { %s333_s19 = smov [#allocation5]  }
   0xf   :  { %s28_s20 = sshll.u32 %s333_s19, 4  ;;  %s29_s20 = int_to_ptr.vmem [resolvable:$true] %s28_s20 }
  0x10   :  { %s292_s21 = scalar_lea.vmem %s29_s20, 1024  ;;  %p297_p6 = scmp.lt.s32.totalorder %s29_s20, %s29_s20 }
  0x11   :  { %p293_p5 = scmp.ne.s32.totalorder %s29_s20, %s292_s21  ;;  %p298_p7 = scmp.lt.s32.totalorder %s292_s21, %s292_s21 }
  0x13   :  { %p299_p8 = por %p298_p7, %p297_p6 }
  0x15   :  { %p300_p9 = pnand %p299_p8, %p293_p5 }
  0x17   :  { %303 = shalt.err (!%p300_p9)
}
  0x18   :  { %34 = dma.hbm_to_vmem [thread:$0]  %s372_s1, 1024, %s29_s20, [#allocation6], %s331_s15, %s331_s15, %s332_s16  }
  0x19   :  { %324 = dma.done.wait [#allocation3], 128  }
  0x1a   :  { %325 = vsyncadd [#allocation3], 4294967168 }
  0x1b   :  { %326 = dma.done.wait [#allocation6], 1024  }
  0x1c   :  { %327 = vsyncadd [#allocation6], 4294966272  ;;  %v334_v0 = vmov 0.0   ;;  %vm335_vm0 = vmmov 0   ;;  %v255_v1 = vld [vmem:[#allocation5 + $0x38] sm:$0xff]   ;;  %v256_v2 = vld [vmem:[#allocation5 + $0x30] sm:$0xff]  }
  0x1d   :  { %226 = vmatprep.subr.bf16.mxu0 %v334_v0  ;;  %242 = vmatprep.mubr.msk.bf16.mxu0 %vm335_vm0, %v334_v0  ;;  %v257_v3 = vld [vmem:[#allocation5 + $0x28] sm:$0xff]   ;;  %v258_v4 = vld [vmem:[#allocation5 + $0x20] sm:$0xff]   ;;  %v259_v5 = vld [vmem:[#allocation5 + $0x18] sm:$0xff]   ;;  %s336_s24 = smov [#allocation7]  }
  0x1e   :  { %227 = vmatpush3.bf16.msra.mxu0 %v255_v1  ;;  %v260_v6 = vld [vmem:[#allocation5 + $0x10] sm:$0xff]   ;;  %v261_v7 = vld [vmem:[#allocation5 + $0x8] sm:$0xff]   ;;  %v262_v8 = vld [vmem:[#allocation5] sm:$0xff]   ;;  %s194_s25 = sshll.u32 %s336_s24, 4  ;;  %s195_s25 = int_to_ptr.vmem [resolvable:$true] %s194_s25 }
  0x1f   :  { %228 = vmatprep.subr.bf16.mxu0 %v334_v0  ;;  %v263_v9 = vld [vmem:[#allocation2] sm:$0xff]   ;;  %s304_s26 = scalar_lea.vmem %s195_s25, 256  ;;  %p309_p11 = scmp.lt.s32.totalorder %s195_s25, %s195_s25 }
  0x20   :  { %v216_v10 = vld [vmem:[%s373_s2] ss:$0 sm:$0xff]  ;;  %p305_p10 = scmp.ne.s32.totalorder %s195_s25, %s304_s26  ;;  %p310_p12 = scmp.lt.s32.totalorder %s304_s26, %s304_s26 }
  0x22   :  { %229 = vmatpush3.bf16.msra.mxu0 %v256_v2  ;;  %p311_p13 = por %p310_p12, %p309_p11 }
  0x23   :  { %230 = vmatprep.subr.bf16.mxu0 %v334_v0 }
  0x24   :  { %p312_p0 = pnand %p311_p13, %p305_p10 }
  0x26   :  { %231 = vmatpush3.bf16.msra.mxu0 %v257_v3 }
  0x27   :  { %232 = vmatprep.subr.bf16.mxu0 %v334_v0 }
  0x2a   :  { %233 = vmatpush3.bf16.msra.mxu0 %v258_v4 }
  0x2b   :  { %234 = vmatprep.subr.bf16.mxu0 %v334_v0 }
  0x2e   :  { %235 = vmatpush3.bf16.msra.mxu0 %v259_v5 }
  0x2f   :  { %236 = vmatprep.subr.bf16.mxu0 %v334_v0 }
  0x32   :  { %237 = vmatpush3.bf16.msra.mxu0 %v260_v6 }
  0x33   :  { %238 = vmatprep.subr.bf16.mxu0 %v334_v0 }
  0x36   :  { %239 = vmatpush3.bf16.msra.mxu0 %v261_v7 }
  0x37   :  { %240 = vmatprep.subr.bf16.mxu0 %v334_v0 }
  0x3a   :  { %241 = vmatpush3.bf16.msra.mxu0 %v262_v8 }
  0x3d   :  { %243 = vmatmul.mubr.bf16.vlgmr.msra.gmra.mxu0 %v263_v9 }
  0xfd   :  { %v150_v11 = vpop.f32.mrf.mxu0 }
  0xfe   :  { %v185_v12 = vadd.f32 %v216_v10, %v150_v11 }
  0xff   :  { %v244_v13 = vpop.f32.mrf.mxu0 }
 0x100   :  { %187 = vst [vmem:[#allocation7] sm:$0xff] %v185_v12 }
 0x101   :  { %v153_v14 = vpop.f32.mrf.mxu0 }
 0x102   :  { %v186_v15 = vadd.f32 %v216_v10, %v153_v14 }
 0x103   :  { %v245_v16 = vpop.f32.mrf.mxu0 }
 0x104   :  { %188 = vst [vmem:[#allocation7 + $0x8] sm:$0xff] %v186_v15 }
 0x105   :  { %315 = shalt.err (!%p312_p0)
}
 0x106   :  { %s337_s27 = smov 128   ;;  %s338_s2 = smov 8  }
 0x107   :  { %200 = dma.vmem_to_hbm [thread:$0]  %s195_s25, 256, %s374_s3, [#allocation4], %s337_s27, %s337_s27, %s338_s2  }
 0x108   :  { %328 = dma.done.wait [#allocation4], 256  }
 0x109   :  { %329 = vsyncadd [#allocation4], 4294967040 }
 0x10a   :  { %204 = vsyncpa [#allocation3], 1 }
 0x10b   :  { %205 = vsyncpa [#allocation6], 1 }
 0x10c   :  { %206 = vsyncpa [#allocation4], 1 }

</bundles_post_ra>
